<compile_context>
chip_gen: v7x
topology: tpu7x:2x2x1
jax: 0.10.0
libtpu: 0.0.40
codegen_flags: <defaults>
</compile_context>

<pallas_src>
import functools

import jax
import jax.numpy as jnp
import numpy as np
from jax import lax
from jax.experimental import pallas as pl
from jax.experimental.pallas import tpu as pltpu


def _round_up(x, m):
    return (x + m - 1) // m * m


def _mmd_loss_kernel(scales_ref, xr_ref, x_ref, s_ref,
                     loss_ref, recons_ref, mmd_ref, acc_ref,
                     *, n_valid_elems, batch, latent_dim):
    i = pl.program_id(0)
    n_tiles = pl.num_programs(0)

    # ---------------- reconstruction MSE (sum of squared diffs) -------------
    @pl.when(i == 0)
    def _init():
        acc_ref[0] = jnp.float32(0.0)

    diff = xr_ref[...].astype(jnp.float32) - x_ref[...].astype(jnp.float32)
    acc_ref[0] += jnp.sum(diff * diff)

    # ---------------- final step: finish MSE + fused-Gram MMD ---------------
    @pl.when(i == n_tiles - 1)
    def _finalize():
        delta = scales_ref[0]
        alpha = scales_ref[1]

        mse = acc_ref[0] * (1.0 / float(n_valid_elems))
        recons_loss = mse * delta

        s = s_ref[...].astype(jnp.float32)        # (P, D): [z ; z_prior ; 0-pad]
        p_rows = s.shape[0]
        # One MXU Gram matrix, contraction on the last dim of both operands
        # (no transpose of the rhs); f32 accumulation.
        g = lax.dot_general(
            s, s, (((1,), (1,)), ((), ())),
            preferred_element_type=jnp.float32)    # (P, P) f32

        two_b = 2 * batch
        row = lax.broadcasted_iota(jnp.int32, (p_rows, p_rows), 0)
        col = lax.broadcasted_iota(jnp.int32, (p_rows, p_rows), 1)

        # Squared norms come from the diagonal of G (no extra matmuls).
        diag = jnp.where(row == col, g, 0.0)
        n2_col = jnp.sum(diag, axis=1, keepdims=True)   # (P, 1)
        n2_row = jnp.sum(diag, axis=0, keepdims=True)   # (1, P)

        # ||si - sj||^2, clamped against tiny negative FP cancellation.
        sq = jnp.maximum(n2_col + n2_row - 2.0 * g, 0.0)
        # torch: exp(-(mean_d (si-sj)^2) / D) == exp(-||si-sj||^2 / D^2)
        k = jnp.exp(-sq * (1.0 / float(latent_dim * latent_dim)))

        in_x_row = row < batch
        in_x_col = col < batch
        in_y_row = (row >= batch) & (row < two_b)
        in_y_col = (col >= batch) & (col < two_b)
        inv_bb = 1.0 / float(batch * batch)
        k_xx = jnp.sum(jnp.where(in_x_row & in_x_col, k, 0.0)) * inv_bb
        k_yy = jnp.sum(jnp.where(in_y_row & in_y_col, k, 0.0)) * inv_bb
        k_xy = jnp.sum(jnp.where(in_x_row & in_y_col, k, 0.0)) * inv_bb

        mmd_loss = (k_xx + k_yy - 2.0 * k_xy) * alpha

        recons_ref[0, 0] = recons_loss
        mmd_ref[0, 0] = mmd_loss
        loss_ref[0, 0] = recons_loss + mmd_loss


def mmd_loss_forward(x_recon, x, z, mu, logvar, alpha, delta, *, key):
    """Pallas implementation of MMDLoss.forward. mu/logvar unused (as in torch)."""
    del mu, logvar
    # z_prior = torch.randn_like(z)  (deterministic via supplied key)
    z_prior = jax.random.normal(key, z.shape, dtype=z.dtype)

    n, c, h, w = x_recon.shape
    rows, hw = n * c, h * w
    n_elems = n * c * h * w

    xr2 = x_recon.reshape(rows, hw)
    x2 = x.reshape(rows, hw)

    # Row-tile sizing: each input tile <= ~6 MiB (2 inputs x 2 pipeline
    # buffers + headroom stays under v7x's 64 MiB VMEM), rows multiple of 8.
    row_bytes = hw * 4
    max_tile_r = max(8, (((6 << 20) // row_bytes) // 8) * 8)
    n_tiles = max(1, -(-rows // max_tile_r))
    tile_r = _round_up(-(-rows // n_tiles), 8)
    padded_rows = tile_r * n_tiles
    if padded_rows != rows:
        pad = padded_rows - rows
        # zero-padded rows contribute 0 to the squared-diff sum;
        # we divide by the true element count in-kernel.
        xr2 = jnp.pad(xr2, ((0, pad), (0, 0)))
        x2 = jnp.pad(x2, ((0, pad), (0, 0)))

    batch, latent = z.shape
    s = jnp.concatenate([z, z_prior], axis=0)            # (2B, D)
    pad_2b = _round_up(2 * batch, 8)                     # sublane-aligned rows
    if pad_2b != 2 * batch:
        s = jnp.pad(s, ((0, pad_2b - 2 * batch), (0, 0)))
    scales = jnp.array([delta, alpha], dtype=jnp.float32)

    kernel = functools.partial(
        _mmd_loss_kernel,
        n_valid_elems=n_elems, batch=batch, latent_dim=latent)

    tile_bytes = tile_r * row_bytes
    vmem_limit = int(min(48 << 20, max(16 << 20, 4 * tile_bytes + (8 << 20))))

    grid_spec = pltpu.PrefetchScalarGridSpec(
        num_scalar_prefetch=0,
        grid=(n_tiles,),
        in_specs=[
            pl.BlockSpec(memory_space=pltpu.MemorySpace.SMEM),    # [delta, alpha]
            pl.BlockSpec((tile_r, hw), lambda i: (i, 0)),         # x_recon tile
            pl.BlockSpec((tile_r, hw), lambda i: (i, 0)),         # x tile
            pl.BlockSpec((pad_2b, latent), lambda i: (0, 0)),     # [z ; z_prior]
        ],
        out_specs=(
            pl.BlockSpec(memory_space=pltpu.MemorySpace.SMEM),
            pl.BlockSpec(memory_space=pltpu.MemorySpace.SMEM),
            pl.BlockSpec(memory_space=pltpu.MemorySpace.SMEM),
        ),
        scratch_shapes=[pltpu.SMEM((1,), jnp.float32)],
    )

    loss, recons_loss, mmd_loss = pl.pallas_call(
        kernel,
        out_shape=(
            jax.ShapeDtypeStruct((1, 1), jnp.float32),
            jax.ShapeDtypeStruct((1, 1), jnp.float32),
            jax.ShapeDtypeStruct((1, 1), jnp.float32),
        ),
        grid_spec=grid_spec,
        compiler_params=pltpu.CompilerParams(
            dimension_semantics=("arbitrary",),      # reduction into accumulator
            vmem_limit_bytes=vmem_limit,
        ),
        cost_estimate=pl.CostEstimate(
            flops=int(3 * n_elems + 2 * pad_2b * pad_2b * latent),
            transcendentals=int(pad_2b * pad_2b),
            bytes_accessed=int(2 * n_elems * 4 + s.size * 4 + 3 * 4),
        ),
    )(scales, xr2, x2, s)

    # TODO(synk): optional v7x 2-TensorCore split of the MSE row range not done;
    # single-core grid is used for portability.
    return loss[0, 0], recons_loss[0, 0], mmd_loss[0, 0]


def _mmd_loss_reference(x_recon, x, z, alpha, delta, key):
    """Pure-JAX reference matching the PyTorch module."""
    z_prior = jax.random.normal(key, z.shape, dtype=z.dtype)
    recons_loss = jnp.mean((x_recon - x) ** 2) * delta
    dim = z.shape[1]

    def kmat(a, b):
        d2 = jnp.mean((a[:, None, :] - b[None, :, :]) ** 2, axis=2) / dim
        return jnp.exp(-d2)

    mmd = (jnp.mean(kmat(z, z)) + jnp.mean(kmat(z_prior, z_prior))
           - 2.0 * jnp.mean(kmat(z, z_prior))) * alpha
    return recons_loss + mmd, recons_loss, mmd


if __name__ == "__main__":
    key = jax.random.PRNGKey(0)
    k1, k2, k3, k4, k5, kprior = jax.random.split(key, 6)

    batch, channels, spatial, latent = 2, 4, 16, 32

    x_recon = jax.random.normal(k1, (batch, channels, spatial, spatial), jnp.float32)
    x = jax.random.normal(k2, (batch, channels, spatial, spatial), jnp.float32)
    z = jax.random.normal(k3, (batch, latent), jnp.float32)
    mu = jax.random.normal(k4, (batch, latent), jnp.float32)
    logvar = jax.random.normal(k5, (batch, latent), jnp.float32)
    alpha = 1.0
    delta = 0.5

    loss, recons_loss, mmd_term = mmd_loss_forward(
        x_recon, x, z, mu, logvar, alpha, delta, key=kprior)
    jax.block_until_ready((loss, recons_loss, mmd_term))

    ref_loss, ref_recons, ref_mmd = _mmd_loss_reference(
        x_recon, x, z, alpha, delta, kprior)
    np.testing.assert_allclose(np.asarray(loss), np.asarray(ref_loss),
                               rtol=2e-3, atol=1e-5)
    np.testing.assert_allclose(np.asarray(recons_loss), np.asarray(ref_recons),
                               rtol=2e-3, atol=1e-5)
    np.testing.assert_allclose(np.asarray(mmd_term), np.asarray(ref_mmd),
                               rtol=2e-3, atol=1e-5)

    print("KERNEL_OK")
</pallas_src>

<mosaic_0001>
module attributes {stable_mosaic.version = 11 : i64} {
  func.func @_mmd_loss_kernel(%arg0: i32, %arg1: memref<2xf32, #tpu.memory_space<smem>>, %arg2: memref<8x256xf32, #tpu.memory_space<vmem>>, %arg3: memref<8x256xf32, #tpu.memory_space<vmem>>, %arg4: memref<8x32xf32, #tpu.memory_space<vmem>>, %arg5: memref<1x1xf32, #tpu.memory_space<smem>>, %arg6: memref<1x1xf32, #tpu.memory_space<smem>>, %arg7: memref<1x1xf32, #tpu.memory_space<smem>>, %arg8: memref<1xf32, #tpu.memory_space<smem>>) attributes {dimension_semantics = [#tpu.dimension_semantics<arbitrary>], iteration_bounds = array<i64: 1>, scalar_prefetch = 0 : i64, scratch_operands = 1 : i64, tpu.core_type = #tpu.core_type<tc>, window_params = [{transform_indices = @transform_0, window_bounds = array<i64: 2>}, {transform_indices = @transform_1, window_bounds = array<i64: 8, 256>}, {transform_indices = @transform_2, window_bounds = array<i64: 8, 256>}, {pipeline_mode = #tpu.pipeline_mode<synchronous>, transform_indices = @transform_3, window_bounds = array<i64: 8, 32>}, {transform_indices = @transform_4, window_bounds = array<i64: 1, 1>}, {transform_indices = @transform_5, window_bounds = array<i64: 1, 1>}, {transform_indices = @transform_6, window_bounds = array<i64: 1, 1>}]} {
    %c0_i32 = arith.constant 0 : i32
    %0 = arith.cmpi eq, %arg0, %c0_i32 : i32
    %1 = arith.extui %0 : i1 to i32
    %c0_i32_0 = arith.constant 0 : i32
    %2 = arith.cmpi ne, %1, %c0_i32_0 : i32
    scf.if %2 {
      %cst_8 = arith.constant 0.000000e+00 : f32
      %c0_9 = arith.constant 0 : index
      %17 = memref.load %arg8[%c0_9] : memref<1xf32, #tpu.memory_space<smem>>
      memref.store %cst_8, %arg8[%c0_9] : memref<1xf32, #tpu.memory_space<smem>>
    } else {
    }
    %c0 = arith.constant 0 : index
    %c0_1 = arith.constant 0 : index
    %3 = vector.load %arg2[%c0, %c0_1] : memref<8x256xf32, #tpu.memory_space<vmem>>, vector<8x256xf32>
    %c0_2 = arith.constant 0 : index
    %c0_3 = arith.constant 0 : index
    %4 = vector.load %arg3[%c0_2, %c0_3] : memref<8x256xf32, #tpu.memory_space<vmem>>, vector<8x256xf32>
    %5 = arith.subf %3, %4 : vector<8x256xf32>
    %c0_4 = arith.constant 0 : index
    %6 = memref.load %arg8[%c0_4] : memref<1xf32, #tpu.memory_space<smem>>
    %7 = arith.mulf %5, %5 : vector<8x256xf32>
    %8 = vector.shape_cast %7 : vector<8x256xf32> to vector<1x8x256xf32>
    %cst = arith.constant dense<0.000000e+00> : vector<1xf32>
    %9 = vector.multi_reduction <add>, %8, %cst [1, 2] : vector<1x8x256xf32> to vector<1xf32>
    %10 = vector.shape_cast %9 : vector<1xf32> to vector<1x1x1xf32>
    %11 = vector.extract %10[0, 0, 0] : f32 from vector<1x1x1xf32>
    %12 = arith.addf %6, %11 : f32
    %c0_5 = arith.constant 0 : index
    %13 = memref.load %arg8[%c0_5] : memref<1xf32, #tpu.memory_space<smem>>
    memref.store %12, %arg8[%c0_5] : memref<1xf32, #tpu.memory_space<smem>>
    %c0_i32_6 = arith.constant 0 : i32
    %14 = arith.cmpi eq, %arg0, %c0_i32_6 : i32
    %15 = arith.extui %14 : i1 to i32
    %c0_i32_7 = arith.constant 0 : i32
    %16 = arith.cmpi ne, %15, %c0_i32_7 : i32
    scf.if %16 {
      %c0_8 = arith.constant 0 : index
      %17 = memref.load %arg1[%c0_8] : memref<2xf32, #tpu.memory_space<smem>>
      %c1 = arith.constant 1 : index
      %18 = memref.load %arg1[%c1] : memref<2xf32, #tpu.memory_space<smem>>
      %c0_9 = arith.constant 0 : index
      %19 = memref.load %arg8[%c0_9] : memref<1xf32, #tpu.memory_space<smem>>
      %cst_10 = arith.constant 4.8828125E-4 : f32
      %20 = arith.mulf %19, %cst_10 : f32
      %21 = arith.mulf %20, %17 : f32
      %c0_11 = arith.constant 0 : index
      %c0_12 = arith.constant 0 : index
      %22 = vector.load %arg4[%c0_11, %c0_12] : memref<8x32xf32, #tpu.memory_space<vmem>>, vector<8x32xf32>
      %cst_13 = arith.constant dense<0.000000e+00> : vector<8x8xf32>
      %23 = tpu.matmul %22, %22, %cst_13 {dimension_numbers = #tpu.dot_dimension_numbers<[1], [1], [0], [0], [0, 0, 1, 0], [], []>} : vector<8x32xf32>, vector<8x32xf32>, vector<8x8xf32> -> vector<8x8xf32>
      %24 = tpu.iota {dimensions = array<i32: 0>} : vector<8x8xi32>
      %25 = tpu.iota {dimensions = array<i32: 1>} : vector<8x8xi32>
      %26 = arith.cmpi eq, %24, %25 : vector<8x8xi32>
      %cst_14 = arith.constant 0.000000e+00 : f32
      %27 = vector.broadcast %cst_14 : f32 to vector<8x8xf32>
      %28 = arith.select %26, %23, %27 : vector<8x8xi1>, vector<8x8xf32>
      %cst_15 = arith.constant dense<0.000000e+00> : vector<8xf32>
      %29 = vector.multi_reduction <add>, %28, %cst_15 [1] : vector<8x8xf32> to vector<8xf32>
      %30 = vector.shape_cast %29 : vector<8xf32> to vector<8x1xf32>
      %cst_16 = arith.constant dense<0.000000e+00> : vector<8xf32>
      %31 = vector.multi_reduction <add>, %28, %cst_16 [0] : vector<8x8xf32> to vector<8xf32>
      %32 = vector.shape_cast %31 : vector<8xf32> to vector<1x8xf32>
      %33 = vector.broadcast %30 : vector<8x1xf32> to vector<8x8xf32>
      %34 = vector.broadcast %32 : vector<1x8xf32> to vector<8x8xf32>
      %35 = arith.addf %33, %34 : vector<8x8xf32>
      %cst_17 = arith.constant 2.000000e+00 : f32
      %36 = vector.broadcast %cst_17 : f32 to vector<8x8xf32>
      %37 = arith.mulf %36, %23 : vector<8x8xf32>
      %38 = arith.subf %35, %37 : vector<8x8xf32>
      %cst_18 = arith.constant 0.000000e+00 : f32
      %39 = vector.broadcast %cst_18 : f32 to vector<8x8xf32>
      %40 = arith.maximumf %38, %39 : vector<8x8xf32>
      %cst_19 = arith.constant 0.000000e+00 : f32
      %41 = vector.broadcast %cst_19 : f32 to vector<8x8xf32>
      %42 = arith.subf %41, %40 : vector<8x8xf32>
      %cst_20 = arith.constant 9.765625E-4 : f32
      %43 = vector.broadcast %cst_20 : f32 to vector<8x8xf32>
      %44 = arith.mulf %42, %43 : vector<8x8xf32>
      %45 = math.exp %44 : vector<8x8xf32>
      %c2_i32 = arith.constant 2 : i32
      %46 = vector.broadcast %c2_i32 : i32 to vector<8x8xi32>
      %47 = arith.cmpi slt, %24, %46 : vector<8x8xi32>
      %c2_i32_21 = arith.constant 2 : i32
      %48 = vector.broadcast %c2_i32_21 : i32 to vector<8x8xi32>
      %49 = arith.cmpi slt, %25, %48 : vector<8x8xi32>
      %c2_i32_22 = arith.constant 2 : i32
      %50 = vector.broadcast %c2_i32_22 : i32 to vector<8x8xi32>
      %51 = arith.cmpi sge, %24, %50 : vector<8x8xi32>
      %c4_i32 = arith.constant 4 : i32
      %52 = vector.broadcast %c4_i32 : i32 to vector<8x8xi32>
      %53 = arith.cmpi slt, %24, %52 : vector<8x8xi32>
      %54 = arith.andi %51, %53 : vector<8x8xi1>
      %c2_i32_23 = arith.constant 2 : i32
      %55 = vector.broadcast %c2_i32_23 : i32 to vector<8x8xi32>
      %56 = arith.cmpi sge, %25, %55 : vector<8x8xi32>
      %c4_i32_24 = arith.constant 4 : i32
      %57 = vector.broadcast %c4_i32_24 : i32 to vector<8x8xi32>
      %58 = arith.cmpi slt, %25, %57 : vector<8x8xi32>
      %59 = arith.andi %56, %58 : vector<8x8xi1>
      %60 = arith.andi %47, %49 : vector<8x8xi1>
      %cst_25 = arith.constant 0.000000e+00 : f32
      %61 = vector.broadcast %cst_25 : f32 to vector<8x8xf32>
      %62 = arith.select %60, %45, %61 : vector<8x8xi1>, vector<8x8xf32>
      %63 = vector.shape_cast %62 : vector<8x8xf32> to vector<1x8x8xf32>
      %cst_26 = arith.constant dense<0.000000e+00> : vector<1xf32>
      %64 = vector.multi_reduction <add>, %63, %cst_26 [1, 2] : vector<1x8x8xf32> to vector<1xf32>
      %65 = vector.shape_cast %64 : vector<1xf32> to vector<1x1x1xf32>
      %66 = vector.extract %65[0, 0, 0] : f32 from vector<1x1x1xf32>
      %cst_27 = arith.constant 2.500000e-01 : f32
      %67 = arith.mulf %66, %cst_27 : f32
      %68 = arith.andi %54, %59 : vector<8x8xi1>
      %cst_28 = arith.constant 0.000000e+00 : f32
      %69 = vector.broadcast %cst_28 : f32 to vector<8x8xf32>
      %70 = arith.select %68, %45, %69 : vector<8x8xi1>, vector<8x8xf32>
      %71 = vector.shape_cast %70 : vector<8x8xf32> to vector<1x8x8xf32>
      %cst_29 = arith.constant dense<0.000000e+00> : vector<1xf32>
      %72 = vector.multi_reduction <add>, %71, %cst_29 [1, 2] : vector<1x8x8xf32> to vector<1xf32>
      %73 = vector.shape_cast %72 : vector<1xf32> to vector<1x1x1xf32>
      %74 = vector.extract %73[0, 0, 0] : f32 from vector<1x1x1xf32>
      %cst_30 = arith.constant 2.500000e-01 : f32
      %75 = arith.mulf %74, %cst_30 : f32
      %76 = arith.andi %47, %59 : vector<8x8xi1>
      %cst_31 = arith.constant 0.000000e+00 : f32
      %77 = vector.broadcast %cst_31 : f32 to vector<8x8xf32>
      %78 = arith.select %76, %45, %77 : vector<8x8xi1>, vector<8x8xf32>
      %79 = vector.shape_cast %78 : vector<8x8xf32> to vector<1x8x8xf32>
      %cst_32 = arith.constant dense<0.000000e+00> : vector<1xf32>
      %80 = vector.multi_reduction <add>, %79, %cst_32 [1, 2] : vector<1x8x8xf32> to vector<1xf32>
      %81 = vector.shape_cast %80 : vector<1xf32> to vector<1x1x1xf32>
      %82 = vector.extract %81[0, 0, 0] : f32 from vector<1x1x1xf32>
      %cst_33 = arith.constant 2.500000e-01 : f32
      %83 = arith.mulf %82, %cst_33 : f32
      %84 = arith.addf %67, %75 : f32
      %cst_34 = arith.constant 2.000000e+00 : f32
      %85 = arith.mulf %cst_34, %83 : f32
      %86 = arith.subf %84, %85 : f32
      %87 = arith.mulf %86, %18 : f32
      %c0_35 = arith.constant 0 : index
      %c0_36 = arith.constant 0 : index
      %88 = memref.load %arg6[%c0_35, %c0_36] : memref<1x1xf32, #tpu.memory_space<smem>>
      memref.store %21, %arg6[%c0_35, %c0_36] : memref<1x1xf32, #tpu.memory_space<smem>>
      %c0_37 = arith.constant 0 : index
      %c0_38 = arith.constant 0 : index
      %89 = memref.load %arg7[%c0_37, %c0_38] : memref<1x1xf32, #tpu.memory_space<smem>>
      memref.store %87, %arg7[%c0_37, %c0_38] : memref<1x1xf32, #tpu.memory_space<smem>>
      %90 = arith.addf %21, %87 : f32
      %c0_39 = arith.constant 0 : index
      %c0_40 = arith.constant 0 : index
      %91 = memref.load %arg5[%c0_39, %c0_40] : memref<1x1xf32, #tpu.memory_space<smem>>
      memref.store %90, %arg5[%c0_39, %c0_40] : memref<1x1xf32, #tpu.memory_space<smem>>
    } else {
    }
    return
  }
  func.func @transform_0(%arg0: i32) -> i32 {
    %c0_i32 = arith.constant 0 : i32
    %c0_i32_0 = arith.constant 0 : i32
    return %c0_i32 : i32
  }
  func.func @transform_1(%arg0: i32) -> (i32, i32) {
    %c0_i32 = arith.constant 0 : i32
    %c0_i32_0 = arith.constant 0 : i32
    return %arg0, %c0_i32 : i32, i32
  }
  func.func @transform_2(%arg0: i32) -> (i32, i32) {
    %c0_i32 = arith.constant 0 : i32
    %c0_i32_0 = arith.constant 0 : i32
    return %arg0, %c0_i32 : i32, i32
  }
  func.func @transform_3(%arg0: i32) -> (i32, i32) {
    %c0_i32 = arith.constant 0 : i32
    %c0_i32_0 = arith.constant 0 : i32
    %c0_i32_1 = arith.constant 0 : i32
    return %c0_i32, %c0_i32_0 : i32, i32
  }
  func.func @transform_4(%arg0: i32) -> (i32, i32) {
    %c0_i32 = arith.constant 0 : i32
    %c0_i32_0 = arith.constant 0 : i32
    %c0_i32_1 = arith.constant 0 : i32
    return %c0_i32, %c0_i32_0 : i32, i32
  }
  func.func @transform_5(%arg0: i32) -> (i32, i32) {
    %c0_i32 = arith.constant 0 : i32
    %c0_i32_0 = arith.constant 0 : i32
    %c0_i32_1 = arith.constant 0 : i32
    return %c0_i32, %c0_i32_0 : i32, i32
  }
  func.func @transform_6(%arg0: i32) -> (i32, i32) {
    %c0_i32 = arith.constant 0 : i32
    %c0_i32_0 = arith.constant 0 : i32
    %c0_i32_1 = arith.constant 0 : i32
    return %c0_i32, %c0_i32_0 : i32, i32
  }
}

</mosaic_0001>

<bundles_post_ra>
// kernel: tpu_custom_call.1
= control target key start
LH: loop header
LB: loop body
LE: loop exit
PB: predicated region body
PF: predicated region fallthrough
CT: control target
= control target key end

     0   :  { %12 = vsyncpa [#allocation5], 0  ;;  %s537_s0 = inlined_call_operand.hbm [shape: f32[2], index: 0, kind: input, shape index: {}]   ;;  %s538_s1 = inlined_call_operand.hbm [shape: f32[8,256], index: 1, kind: input, shape index: {}]   ;;  %s539_s2 = inlined_call_operand.hbm [shape: f32[8,256], index: 2, kind: input, shape index: {}]   ;;  %s540_s3 = inlined_call_operand.vmem [shape: f32[8,32], index: 3, kind: input, shape index: {}]   ;;  %s541_s4 = inlined_call_operand.hbm [shape: f32[1,1], index: 4, kind: output, shape index: {0}]   ;;  %s542_s5 = inlined_call_operand.hbm [shape: f32[1,1], index: 5, kind: output, shape index: {1}]   ;;  %s543_s6 = inlined_call_operand.hbm [shape: f32[1,1], index: 6, kind: output, shape index: {2}]  }
   0x1   :  { %13 = vsyncpa [#allocation4], 0 }
   0x2   :  { %14 = vsyncpa [#allocation9], 0 }
   0x3   :  { %15 = vsyncpa [#allocation6], 0 }
   0x4   :  { %16 = vsyncpa [#allocation12], 0  ;;  %s317_s23 = scalar_lea.hbm %s537_s0, 16 }
   0x5   :  { %p318_p0 = scmp.ne.s32.totalorder %s537_s0, %s317_s23  ;;  %p321_p1 = scmp.lt.u32.totalorder %s317_s23, %s537_s0 }
   0x7   :  { %p323_p2 = pnand %p321_p1, %p318_p0 }
   0x9   :  { %326 = shalt.err (!%p323_p2)
}
   0xa   :  { %s411_s28 = smov [#allocation3]   ;;  %s412_s7 = smov [#allocation7]  }
   0xb   :  { %24 = dma.hbm_to_smem %s537_s0, 16, %s411_s28, [#allocation5]  }
   0xc   :  { %s31_s8 = sshll.u32 %s412_s7, 4  ;;  %s413_s9 = smov [#allocation8]   ;;  %s32_s8 = int_to_ptr.vmem [resolvable:$true] %s31_s8 }
   0xd   :  { %s41_s10 = sshll.u32 %s413_s9, 4  ;;  %s327_s13 = scalar_lea.hbm %s538_s1, 256  ;;  %s42_s10 = int_to_ptr.vmem [resolvable:$true] %s41_s10 }
   0xe   :  { %p328_p3 = scmp.ne.s32.totalorder %s538_s1, %s327_s13  ;;  %p331_p4 = scmp.lt.u32.totalorder %s327_s13, %s538_s1 }
  0x10   :  { %p333_p5 = pnand %p331_p4, %p328_p3 }
  0x12   :  { %336 = shalt.err (!%p333_p5)
}
  0x13   :  { %s337_s0 = scalar_lea.vmem %s32_s8, 256  ;;  %p342_p7 = scmp.lt.s32.totalorder %s32_s8, %s32_s8 }
  0x14   :  { %p338_p6 = scmp.ne.s32.totalorder %s32_s8, %s337_s0  ;;  %p343_p8 = scmp.lt.s32.totalorder %s337_s0, %s337_s0 }
  0x16   :  { %p344_p9 = por %p343_p8, %p342_p7 }
  0x18   :  { %p345_p10 = pnand %p344_p9, %p338_p6 }
  0x1a   :  { %348 = shalt.err (!%p345_p10)
}
  0x1b   :  { %34 = dma.hbm_to_vmem [thread:$0]  %s538_s1, 256, %s32_s8, [#allocation4]  }
  0x1c   :  { %s349_s22 = scalar_lea.hbm %s539_s2, 256 }
  0x1d   :  { %p350_p11 = scmp.ne.s32.totalorder %s539_s2, %s349_s22  ;;  %p353_p12 = scmp.lt.u32.totalorder %s349_s22, %s539_s2 }
  0x1f   :  { %p355_p13 = pnand %p353_p12, %p350_p11 }
  0x21   :  { %358 = shalt.err (!%p355_p13)
}
  0x22   :  { %s359_s27 = scalar_lea.vmem %s42_s10, 256  ;;  %p364_p1 = scmp.lt.s32.totalorder %s42_s10, %s42_s10 }
  0x23   :  { %p360_p0 = scmp.ne.s32.totalorder %s42_s10, %s359_s27  ;;  %p365_p2 = scmp.lt.s32.totalorder %s359_s27, %s359_s27 }
  0x25   :  { %p366_p3 = por %p365_p2, %p364_p1 }
  0x27   :  { %p367_p4 = pnand %p366_p3, %p360_p0 }
  0x29   :  { %370 = shalt.err (!%p367_p4)
}
  0x2a   :  { %44 = dma.hbm_to_vmem [thread:$0]  %s539_s2, 256, %s42_s10, [#allocation9]  }
  0x2b   :  { %401 = dma.done.wait [#allocation5], 16  }
  0x2c   :  { %402 = vsyncadd [#allocation5], 4294967280 }
  0x2d   :  { %403 = dma.done.wait [#allocation4], 256  }
  0x2e   :  { %404 = vsyncadd [#allocation4], 4294967040 }
  0x2f   :  { %405 = dma.done.wait [#allocation9], 256  }
  0x30   :  { %406 = vsyncadd [#allocation9], 4294967040 }
  0x31   :  { %56 = sfence }
  0x32   :  { %v93_v0 = vld [vmem:[%s540_s3] sm:$0xff]  ;;  %vm94_vm0 = vcmask 261120   ;;  %v414_v1 = vmov 0.0   ;;  %vm415_vm1 = vmmov 0   ;;  %v168_v2 = vlaneseq  ;;  %v63_v9 = vld [vmem:[#allocation7] sm:$0xff]  ;;  %v64_v10 = vld [vmem:[#allocation7 + $0x8] sm:$0xff] }
  0x33   :  { %294 = vmatprep.subr.mxu0 %v414_v1  ;;  %296 = vmatprep.mubr.msk.f32.mxu0 %vm415_vm1, %v414_v1  ;;  %vm174_vm3 = vcmask 64512   ;;  %v65_v11 = vld [vmem:[#allocation8] sm:$0xff]  ;;  %v66_v12 = vld [vmem:[#allocation8 + $0x8] sm:$0xff]  ;;  %s88_s2 = sld [smem:[#allocation3]]  ;;  %s371_s11 = scalar_lea.hbm %s542_s5, 16 }
  0x34   :  { %295 = vmatpush3.xpose.msk.msra.mxu0 %vm94_vm0, %v93_v0  ;;  %v169_v3 = vshrl.u32 %v168_v2, 7  ;;  %v171_v4 = vand.u32 127, %v168_v2  ;;  %v67_v13 = vsub.f32 %v63_v9, %v65_v11  ;;  %v68_v14 = vsub.f32 %v64_v10, %v66_v12  ;;  %p372_p5 = scmp.ne.s32.totalorder %s542_s5, %s371_s11  ;;  %p375_p6 = scmp.lt.u32.totalorder %s371_s11, %s542_s5 }
  0x36   :  { %vm172_vm2 = vcmp.eq.s32.totalorder %v169_v3, %v171_v4  ;;  %v70_v15 = vmul.f32 %v67_v13, %v67_v13  ;;  %v71_v16 = vmul.f32 %v68_v14, %v68_v14  ;;  %vm197_vm4 = vcmp.ge.s32.totalorder %v171_v4, 2  ;;  %p377_p7 = pnand %p375_p6, %p372_p5 }
  0x37   :  { %297 = vmatmul.mubr.msk.f32.vlgmr.msra.gmra.mrb[0].mxu0 %vm94_vm0, %v93_v0  ;;  %vm198_vm5 = vcmp.lt.s32.totalorder %v171_v4, 4  ;;  %vm192_vm6 = vcmp.lt.s32.totalorder %v169_v3, 2  ;;  %vm193_vm7 = vcmp.lt.s32.totalorder %v171_v4, 2  ;;  %vm194_vm8 = vcmp.ge.s32.totalorder %v169_v3, 2 }
  0x38   :  { %v72_v17 = vadd.f32 %v71_v16, %v70_v15  ;;  %vm195_vm9 = vcmp.lt.s32.totalorder %v169_v3, 4  ;;  %vm199_vm10 = vmand %vm197_vm4, %vm198_vm5 }
  0x39   :  { %vm200_vm11 = vmand %vm192_vm6, %vm193_vm7 }
  0x3a   :  { %vm196_vm12 = vmand %vm194_vm8, %vm195_vm9 }
  0x3b   :  { %vm226_vm13 = vmand %vm192_vm6, %vm199_vm10 }
  0x3c   :  { %vm213_vm14 = vmand %vm196_vm12, %vm199_vm10 }
 0x10a   :  { %v164_v5 = vpop.f32.mrb[0].mxu0 }
 0x10b   :  { %v173_v6 = vsel %vm172_vm2, %v164_v5, 0.0  ;;  %v298_v7 = vpop.f32.mrb[1].mxu0  ;;  %v185_v25 = vmul.f32 2.0, %v164_v5 }
 0x10c   :  { %v175_v8 = vsel %vm174_vm3, %v173_v6, 0.0 }
 0x10d   :  { %176 = vadd.xlane.f32.xlu0 %v175_v8  ;;  %v178_v18 = vrot.slane %v175_v8, 4 }
 0x10f   :  { %v179_v19 = vadd.f32 %v178_v18, %v175_v8 }
 0x111   :  { %73 = vadd.xlane.f32.xlu0 %v72_v17  ;;  %v180_v20 = vrot.slane %v179_v19, 2 }
 0x113   :  { %v181_v21 = vadd.f32 %v180_v20, %v179_v19 }
 0x115   :  { %v182_v22 = vrot.slane %v181_v21, 1 }
 0x117   :  { %v183_v23 = vadd.f32 %v182_v22, %v181_v21 }
 0x19a   :  { %v177_v24 = vpop.xlane.xlu0 %176 }
 0x19b   :  { %v184_v26 = vadd.f32 %v183_v23, %v177_v24 }
 0x19d   :  { %v186_v27 = vsub.f32 %v184_v26, %v185_v25 }
 0x19e   :  { %v74_v39 = vpop.xlane.xlu0 %73 }
 0x19f   :  { %v187_v28 = vmax.f32 %v186_v27, 0.0  ;;  %v75_v40 = vrot.slane %v74_v39, 4 }
 0x1a1   :  { %v188_v29 = vsub.f32 0.0, %v187_v28  ;;  %v76_v41 = vadd.f32 %v75_v40, %v74_v39 }
 0x1a3   :  { %v189_v30 = vmul.f32 0.0009765625, %v188_v29  ;;  %v77_v42 = vrot.slane %v76_v41, 2 }
 0x1a5   :  { %v190_v31 = vmul.f32 1.442695, %v189_v30  ;;  %v78_v43 = vadd.f32 %v77_v42, %v76_v41 }
 0x1a7   :  { %315 = vpow2.f32 %v190_v31  ;;  %v79_v44 = vrot.slane %v78_v43, 1 }
 0x1a9   :  { %v80_v45 = vadd.f32 %v79_v44, %v78_v43 }
 0x1ab   :  { %299 = vpush %v80_v45 }
 0x1b1   :  { %v316_v32 = vpop.eup %315 }
 0x1b2   :  { %v201_v33 = vsel %vm200_vm11, %v316_v32, 0.0  ;;  %v227_v34 = vsel %vm226_vm13, %v316_v32, 0.0  ;;  %v214_v37 = vsel %vm213_vm14, %v316_v32, 0.0 }
 0x1b3   :  { %v202_v35 = vsel %vm174_vm3, %v201_v33, 0.0  ;;  %v228_v36 = vsel %vm174_vm3, %v227_v34, 0.0  ;;  %v215_v38 = vsel %vm174_vm3, %v214_v37, 0.0 }
 0x1b4   :  { %203 = vadd.xlane.f32.xlu1 %v202_v35  ;;  %229 = vadd.xlane.f32.xlu0 %v228_v36 }
 0x1b8   :  { %216 = vadd.xlane.f32.xlu1 %v215_v38 }
 0x1dc   :  { %s300_s3 = spop %299 }
 0x1dd   :  { %s91_s7 = smul.f32 0.00048828125, %s300_s3 }
 0x1df   :  { %s497_s8 = smul.f32 %s91_s7, %s88_s2 }
 0x1e1   :  { %244 = sst [smem:[#allocation11]] %s497_s8 }
 0x1e2   :  { %380 = shalt.err (!%p377_p7)
}
 0x1e3   :  { %s416_s16 = smov [#allocation11]   ;;  %s289_s18 = sld [smem:[#allocation3 + $0x1]] }
 0x1e4   :  { %265 = dma.smem_to_hbm %s416_s16, 16, %s542_s5, [#allocation12]  }
 0x1e5   :  { %s381_s30 = scalar_lea.hbm %s541_s4, 16 }
 0x1e6   :  { %p382_p8 = scmp.ne.s32.totalorder %s541_s4, %s381_s30  ;;  %p385_p9 = scmp.lt.u32.totalorder %s381_s30, %s541_s4 }
 0x1e8   :  { %p387_p10 = pnand %p385_p9, %p382_p8 }
 0x241   :  { %v204_v46 = vpop.xlane.xlu1 %203  ;;  %v230_v47 = vpop.xlane.xlu0 %229 }
 0x242   :  { %v205_v48 = vrot.slane %v204_v46, 4  ;;  %v231_v49 = vrot.slane %v230_v47, 4 }
 0x244   :  { %v206_v50 = vadd.f32 %v205_v48, %v204_v46  ;;  %v232_v51 = vadd.f32 %v231_v49, %v230_v47 }
 0x245   :  { %v217_v52 = vpop.xlane.xlu1 %216 }
 0x246   :  { %v207_v53 = vrot.slane %v206_v50, 2  ;;  %v233_v54 = vrot.slane %v232_v51, 2  ;;  %v218_v55 = vrot.slane %v217_v52, 4 }
 0x248   :  { %v219_v56 = vadd.f32 %v218_v55, %v217_v52  ;;  %v208_v57 = vadd.f32 %v207_v53, %v206_v50  ;;  %v234_v58 = vadd.f32 %v233_v54, %v232_v51 }
 0x24a   :  { %v220_v59 = vrot.slane %v219_v56, 2  ;;  %v209_v60 = vrot.slane %v208_v57, 1  ;;  %v235_v63 = vrot.slane %v234_v58, 1 }
 0x24c   :  { %v221_v61 = vadd.f32 %v220_v59, %v219_v56  ;;  %v210_v62 = vadd.f32 %v209_v60, %v208_v57  ;;  %v236_v2 = vadd.f32 %v235_v63, %v234_v58 }
 0x24e   :  { %301 = vpush %v210_v62  ;;  %v222_v0 = vrot.slane %v221_v61, 1 }
 0x250   :  { %v223_v1 = vadd.f32 %v222_v0, %v221_v61 }
 0x252   :  { %303 = vpush %v223_v1 }
 0x253   :  { %305 = vpush %v236_v2 }
 0x27f   :  { %s302_s5 = spop %301 }
 0x280   :  { %s212_s19 = smul.f32 0.25, %s302_s5 }
 0x283   :  { %s304_s20 = spop %303 }
 0x284   :  { %s225_s21 = smul.f32 0.25, %s304_s20  ;;  %s306_s22 = spop %305 }
 0x285   :  { %s238_s23 = smul.f32 0.25, %s306_s22 }
 0x286   :  { %s239_s24 = sadd.f32 %s225_s21, %s212_s19 }
 0x287   :  { %s240_s25 = smul.f32 2.0, %s238_s23 }
 0x289   :  { %s241_s26 = ssub.f32 %s239_s24, %s240_s25 }
 0x28b   :  { %s242_s27 = smul.f32 %s289_s18, %s241_s26 }
 0x28d   :  { %s247_s1 = sadd.f32 %s242_s27, %s497_s8 }
 0x28e   :  { %246 = sst [smem:[#allocation13]] %s242_s27 }
 0x28f   :  { %249 = sst [smem:[#allocation10]] %s247_s1 }
 0x290   :  { %390 = shalt.err (!%p387_p10)
}
 0x291   :  { %s417_s10 = smov [#allocation10]   ;;  %s391_s14 = scalar_lea.hbm %s543_s6, 16 }
 0x292   :  { %257 = dma.smem_to_hbm %s417_s10, 16, %s541_s4, [#allocation6]  }
 0x293   :  { %p392_p11 = scmp.ne.s32.totalorder %s543_s6, %s391_s14  ;;  %p395_p12 = scmp.lt.u32.totalorder %s391_s14, %s543_s6 }
 0x295   :  { %p397_p13 = pnand %p395_p12, %p392_p11 }
 0x297   :  { %400 = shalt.err (!%p397_p13)
}
 0x298   :  { %s418_s5 = smov [#allocation13]  }
 0x299   :  { %273 = dma.smem_to_hbm %s418_s5, 16, %s543_s6, [#allocation12]  }
 0x29a   :  { %407 = dma.done.wait [#allocation6], 16  }
 0x29b   :  { %408 = vsyncadd [#allocation6], 4294967280 }
 0x29c   :  { %409 = dma.done.wait [#allocation12], 32  }
 0x29d   :  { %410 = vsyncadd [#allocation12], 4294967264 }
 0x29e   :  { %283 = sfence }
 0x29f   :  { %284 = vsyncpa [#allocation4], 1 }
 0x2a0   :  { %285 = vsyncpa [#allocation9], 1 }
 0x2a1   :  { %286 = vsyncpa [#allocation5], 1 }
 0x2a2   :  { %287 = vsyncpa [#allocation6], 1 }
 0x2a3   :  { %288 = vsyncpa [#allocation12], 1 }

</bundles_post_ra>
